<compile_context>
chip_gen: v7x
topology: tpu7x:2x2x1
jax: 0.10.0
libtpu: 0.0.40
codegen_flags: <defaults>
</compile_context>

<pallas_src>
import functools

import jax
import jax.numpy as jnp
from jax.experimental import pallas as pl
from jax.experimental.pallas import tpu as pltpu

EPS = 1e-06
LANE = 128


def _round_up(x, m):
    return (x + m - 1) // m * m


def _cdiv(a, b):
    return -(-a // b)


def _vmem_capacity_bytes():
    try:
        return int(pltpu.get_tpu_info().vmem_capacity_bytes)
    except Exception:
        return 64 * 1024 * 1024          # conservative default: v7x per-TensorCore VMEM


def _choose_tile_sublanes(c_stream, n_rows, itemsize, sub_align, vmem_cap):
    """Pick the per-step spatial tile (in 128-lane sublanes) for this chip/dtype."""
    # Stream ~6 MiB of logits per step on 128 MiB-VMEM parts (v5e/v6e), ~2 MiB on v7x.
    target_in = (6 << 20) if vmem_cap >= (96 << 20) else (2 << 20)
    ts = max(sub_align,
             (target_in // (c_stream * LANE * itemsize)) // sub_align * sub_align)
    # Keep double-buffered input blocks + ~7 slab-sized f32 temporaries under ~40% VMEM.
    per_sub = LANE * (2 * c_stream * itemsize + 2 * 4 + 7 * n_rows * 4)
    ts_budget = max(sub_align,
                    (int(vmem_cap * 0.4) // per_sub) // sub_align * sub_align)
    return min(ts, ts_budget)


def _tversky_sums_kernel(logits_ref, targets_ref, sump_ref, sumpo_ref, cnt_ref, *,
                         ignore_index, binary_from_single, n_rows, limit, lane_exact):
    """Accumulate per-class partial sums over one (batch, spatial-slab) block.

    logits_ref : (1, C_in, SUB, 128)   caller dtype
    targets_ref: (1, SUB, 128)         int32
    sump/sumpo/cnt refs: (1, 1, n_rows, 128) f32, resident across the inner grid axis.
    """
    si = pl.program_id(2)

    @pl.when(si == 0)
    def _init():
        sump_ref[...] = jnp.zeros_like(sump_ref)
        sumpo_ref[...] = jnp.zeros_like(sumpo_ref)
        cnt_ref[...] = jnp.zeros_like(cnt_ref)

    sub = targets_ref.shape[1]
    gb = pl.program_id(1) * pl.num_programs(2) + si       # global spatial block index
    start_sub = gb * sub

    # In-bounds mask covers: partial tail blocks, the fully-masked overhang block of an
    # uneven two-core split, and (when lane_exact=False) the sub-128 spatial remainder.
    rows = jax.lax.broadcasted_iota(jnp.int32, (sub, LANE), 0)
    if lane_exact:
        inb = (start_sub + rows) < limit                   # limit = real sub_total
    else:
        cols = jax.lax.broadcasted_iota(jnp.int32, (sub, LANE), 1)
        inb = (start_sub + rows) * LANE + cols < limit     # limit = real spatial size

    t = targets_ref[0]                                     # (SUB, 128) int32
    valid = jnp.logical_and(inb, t != ignore_index)
    validf = valid.astype(jnp.float32)
    t_eff = jnp.where(valid, t, -1)                        # -1 never matches a class id

    x = logits_ref[0].astype(jnp.float32)                  # (C_in, SUB, 128)
    # Zero out-of-bounds logits BEFORE exp so garbage tail data can never produce NaN.
    x = jnp.where(inb[None], x, 0.0)

    if binary_from_single:
        # softmax([-x, x])[1] == sigmoid(2x): no 2-channel pair, no full softmax.
        p1 = pl.reciprocal(1.0 + jnp.exp(-2.0 * x[0]), approx=False) * validf
        p = jnp.concatenate([(validf - p1)[None], p1[None]], axis=0)   # (2, SUB, 128)
    else:
        # Numerically stable softmax over the class (leading) axis -> elementwise VPU.
        m = jnp.max(x, axis=0)                             # (SUB, 128)
        e = jnp.exp(x - m[None])                           # EUP
        scale = validf * pl.reciprocal(jnp.sum(e, axis=0), approx=False)
        p = e * scale[None]                                # masked softmax, (C, SUB, 128)

    # Select-based "one-hot": no int->f32 convert, no per-pixel multiplies.
    class_ids = jax.lax.broadcasted_iota(jnp.int32, (n_rows, 1, 1), 0)
    eq = class_ids == t_eff[None]                          # (C, SUB, 128) bool

    # Sublane-only reductions; lanes stay dense (final 128-lane sum happens in JAX).
    sump_ref[...] += jnp.sum(p, axis=1)[None, None]
    sumpo_ref[...] += jnp.sum(jnp.where(eq, p, 0.0), axis=1)[None, None]
    cnt_ref[...] += jnp.sum(jnp.where(eq, 1.0, 0.0), axis=1)[None, None]


def tversky_loss(logits, targets, *,
                 alpha=0.5, beta=0.5, gamma=1.0,
                 ignore_index=255, label_smoothing=0.05,
                 num_classes=2, dynamic_weights=True,
                 class_weight=None, reduction="mean",
                 channel_first=True, _tile_sublanes=None):
    """JAX/Pallas equivalent of TverskyLoss.forward."""
    if ignore_index is None:
        ignore_index = 255
    if not channel_first:
        # TODO(synk): fuse channel-last layout into the kernel instead of an HBM transpose.
        logits = jnp.moveaxis(logits, -1, 1)

    B = logits.shape[0]
    C_in = logits.shape[1]
    binary_from_single = (C_in == 1)
    if binary_from_single:
        n_cls = 2
    elif C_in == num_classes:
        n_cls = num_classes
    else:
        raise ValueError("channel count does not match num_classes")

    spatial = 1
    for d in logits.shape[2:]:
        spatial *= d

    # Targets are tiny next to the logits stream: widen them once to one int32 tiling.
    targets = targets.astype(jnp.int32)

    logits_flat = logits.reshape(B, C_in, spatial)
    targets_flat = targets.reshape(B, spatial)

    lane_exact = (spatial % LANE == 0)
    padded = spatial if lane_exact else _round_up(spatial, LANE)
    if padded != spatial:
        # TODO(synk): only triggers when H*W is not a multiple of 128; padded pixels are
        # excluded in-kernel by their flat pixel index, so the pad values never matter.
        logits_flat = jnp.pad(logits_flat, ((0, 0), (0, 0), (0, padded - spatial)))
        targets_flat = jnp.pad(targets_flat, ((0, 0), (0, padded - spatial)))
    sub_total = padded // LANE
    logits_r = logits_flat.reshape(B, C_in, sub_total, LANE)     # free metadata reshape
    targets_r = targets_flat.reshape(B, sub_total, LANE)

    itemsize = logits.dtype.itemsize
    sub_align = max(8, 32 // max(itemsize, 1))       # f32 -> 8, bf16 -> 16, 8-bit -> 32
    vmem_cap = _vmem_capacity_bytes()
    ts_sub = _choose_tile_sublanes(C_in, n_cls, itemsize, sub_align, vmem_cap)
    if _tile_sublanes is not None:                   # test hook to force small tiles
        ts_sub = max(sub_align, _round_up(int(_tile_sublanes), sub_align))
    if sub_total <= ts_sub:
        ts_sub = sub_total                           # single full-extent block
        n_blocks = 1
    else:
        n_blocks = _cdiv(sub_total, ts_sub)          # ragged tail masked in-kernel

    # Give v7x's two TensorCores parallel work when the batch is 1, even for an odd
    # block count (the overhanging block is fully masked inside the kernel).
    if B == 1 and n_blocks >= 2:
        n_so, n_si = 2, _cdiv(n_blocks, 2)
    else:
        n_so, n_si = 1, n_blocks

    limit = sub_total if lane_exact else spatial

    kernel = functools.partial(
        _tversky_sums_kernel,
        ignore_index=int(ignore_index),
        binary_from_single=binary_from_single,
        n_rows=n_cls,
        limit=int(limit),
        lane_exact=lane_exact,
    )

    def _logits_idx(b, so, si):
        gb = jnp.minimum(so * n_si + si, n_blocks - 1)   # overhang re-reads last block
        return (b, 0, gb, 0)

    def _targets_idx(b, so, si):
        gb = jnp.minimum(so * n_si + si, n_blocks - 1)
        return (b, gb, 0)

    out_sd = jax.ShapeDtypeStruct((B, n_so, n_cls, LANE), jnp.float32)
    out_spec = pl.BlockSpec((1, 1, n_cls, LANE), lambda b, so, si: (b, so, 0, 0))

    # VMEM limit derived from the actual block sizes (double-buffered inputs + ~7 f32
    # slab temporaries), capped at 75% of the chip's physical VMEM.
    per_step_bytes = ts_sub * LANE * (2 * C_in * itemsize + 2 * 4 + 7 * n_cls * 4)
    vmem_limit = int(min(0.75 * vmem_cap, max(2 * per_step_bytes, 32 << 20)))

    sump, sumpo, cnt = pl.pallas_call(
        kernel,
        out_shape=(out_sd, out_sd, out_sd),
        grid_spec=pltpu.PrefetchScalarGridSpec(
            num_scalar_prefetch=0,
            grid=(B, n_so, n_si),
            in_specs=[
                pl.BlockSpec((1, C_in, ts_sub, LANE), _logits_idx),
                pl.BlockSpec((1, ts_sub, LANE), _targets_idx),
            ],
            out_specs=[out_spec, out_spec, out_spec],
        ),
        compiler_params=pltpu.CompilerParams(
            dimension_semantics=("parallel", "parallel", "arbitrary"),
            vmem_limit_bytes=vmem_limit),
    )(logits_r, targets_r)

    # ---- tiny (B, C) finalisation in plain JAX ----
    sumP = sump.sum(axis=(1, 3))       # (B, C)  sum of masked softmax probabilities
    sumPO = sumpo.sum(axis=(1, 3))     # (B, C)  sum of p at the target class
    cntv = cnt.sum(axis=(1, 3))        # (B, C)  valid-pixel count per class

    ls = float(label_smoothing)
    if ls > 0:
        a = ls / (n_cls - 1)
        if a >= 1.0 - ls:              # degenerate clamp: everything pins to max
            a, bcoef = 1.0 - ls, 0.0
        else:
            bcoef = 1.0 - ls - a       # smoothed target = a + bcoef * onehot
    else:
        a, bcoef = 0.0, 1.0

    valid_b = cntv.sum(axis=1)                          # (B,)
    ignored_b = float(spatial) - valid_b                # real (unpadded) ignored pixels
    is_cls0 = (jnp.arange(n_cls) == 0).astype(jnp.float32)[None]
    count_all = cntv + ignored_b[:, None] * is_cls0     # bincount of (targets * mask)

    tp = a * sumP + bcoef * sumPO
    fp = jnp.maximum(sumP - tp, 0.0)
    fn = jnp.maximum(a * float(spatial) + bcoef * count_all - tp, 0.0)

    class_counts = cntv.sum(axis=0)                     # (C,) global valid bincount
    total_pixels = class_counts.sum()

    if class_weight is not None:
        cw = jnp.asarray(class_weight, dtype=jnp.float32).reshape(-1)
        if cw.shape[0] != n_cls:
            if cw.shape[0] == 1 and n_cls == 2:
                cw = jnp.concatenate([1.0 - cw, cw])
            else:
                raise ValueError("class_weight size does not match num_classes")
        else:
            cw = cw / cw.sum()
    elif not dynamic_weights:
        cw = jnp.ones((n_cls,), dtype=jnp.float32)
    else:
        cw = jnp.where(class_counts > 0,
                       total_pixels / (n_cls * jnp.maximum(class_counts, 1.0)),
                       0.0)
    cw = cw.reshape(1, n_cls)

    tpw, fpw, fnw = tp * cw, fp * cw, fn * cw
    tversky_index = (tpw + EPS) / (tpw + alpha * fpw + beta * fnw + EPS)
    loss = jnp.power(1.0 - tversky_index, 1.0 / gamma)

    if reduction == "mean":
        out = loss.mean()
    elif reduction == "sum":
        out = loss.sum()
    elif reduction == "batchmean":
        out = loss.sum() / B
    elif reduction == "none":
        out = loss
    else:
        raise ValueError(f"Unsupported reduction method: {reduction}")

    # PyTorch returns 0.0 when every pixel is ignored.
    return jnp.where(total_pixels > 0, out, jnp.zeros_like(out))


def _reference_loss(logits, targets, *, alpha=0.5, beta=0.5, gamma=1.0,
                    ignore_index=255, label_smoothing=0.05, num_classes=2):
    """Pure-jnp mirror of the PyTorch module (dynamic weights, mean) for validation."""
    logits = logits.astype(jnp.float32)
    if logits.shape[1] == 1:
        logits = jnp.concatenate([-logits, logits], axis=1)
        num_classes = 2
    mask = targets != ignore_index
    p = jax.nn.softmax(logits, axis=1) * mask[:, None].astype(jnp.float32)
    tc = jnp.where(mask, targets, 0)
    onehot = jax.nn.one_hot(tc, num_classes, axis=1)                  # (B, C, H, W)
    if label_smoothing > 0:
        tgt = jnp.clip(onehot, label_smoothing / (num_classes - 1), 1.0 - label_smoothing)
    else:
        tgt = onehot
    counts = jnp.sum(jax.nn.one_hot(targets, num_classes)
                     * mask[..., None].astype(jnp.float32), axis=(0, 1, 2))
    total = counts.sum()
    cw = jnp.where(counts > 0, total / (num_classes * jnp.maximum(counts, 1.0)), 0.0)[None]
    dim = (2, 3)
    tp = (p * tgt).sum(dim) * cw
    fp = (p * (1.0 - tgt)).sum(dim) * cw
    fn = ((1.0 - p) * tgt).sum(dim) * cw
    idx = (tp + EPS) / (tp + alpha * fp + beta * fn + EPS)
    loss = jnp.power(1.0 - idx, 1.0 / gamma)
    return jnp.where(total > 0, loss.mean(), 0.0)


if __name__ == "__main__":
    key = jax.random.PRNGKey(0)
    ks = jax.random.split(key, 10)

    # ---- 1) multi-class f32: B=2, C=4, 16x16 (with ignored pixels) ----
    B, C, H, W = 2, 4, 16, 16
    logits = jax.random.normal(ks[0], (B, C, H, W), dtype=jnp.float32)
    targets = jax.random.randint(ks[1], (B, H, W), 0, C).astype(jnp.int32)
    ignore = jax.random.bernoulli(ks[2], 0.1, (B, H, W))
    targets = jnp.where(ignore, 255, targets)

    fn = jax.jit(functools.partial(tversky_loss, num_classes=C))
    loss = jax.block_until_ready(fn(logits, targets))
    ref = _reference_loss(logits, targets, num_classes=C)
    assert jnp.allclose(loss, ref, rtol=2e-3, atol=2e-3), (loss, ref)

    # ---- 2) bf16 logits stream straight into the kernel (f32 widening in-kernel) ----
    logits_bf16 = logits.astype(jnp.bfloat16)
    loss_bf16 = jax.block_until_ready(fn(logits_bf16, targets))
    ref_bf16 = _reference_loss(logits_bf16.astype(jnp.float32), targets, num_classes=C)
    assert jnp.allclose(loss_bf16, ref_bf16, rtol=5e-3, atol=5e-3), (loss_bf16, ref_bf16)

    # ---- 3) binary single-channel path: sigmoid(2x) in-kernel, no HBM concat ----
    logits_bin = jax.random.normal(ks[3], (B, 1, H, W), dtype=jnp.float32)
    targets_bin = jax.random.randint(ks[4], (B, H, W), 0, 2).astype(jnp.int32)
    fn_bin = jax.jit(functools.partial(tversky_loss, num_classes=2))
    loss_bin = jax.block_until_ready(fn_bin(logits_bin, targets_bin))
    ref_bin = _reference_loss(logits_bin, targets_bin, num_classes=2)
    assert jnp.allclose(loss_bin, ref_bin, rtol=2e-3, atol=2e-3), (loss_bin, ref_bin)

    # ---- 4) B=1 with odd block count: uneven two-core split, partial tail block,
    #         and a fully-masked overhang block (forced small tile) ----
    B1, C1, H1, W1 = 1, 4, 44, 64       # 2816 px = 22 sublanes -> 3 blocks of 8
    logits1 = jax.random.normal(ks[5], (B1, C1, H1, W1), dtype=jnp.float32)
    targets1 = jax.random.randint(ks[6], (B1, H1, W1), 0, C1).astype(jnp.int32)
    ignore1 = jax.random.bernoulli(ks[7], 0.15, (B1, H1, W1))
    targets1 = jnp.where(ignore1, 255, targets1)
    fn1 = jax.jit(functools.partial(tversky_loss, num_classes=C1, _tile_sublanes=8))
    loss1 = jax.block_until_ready(fn1(logits1, targets1))
    ref1 = _reference_loss(logits1, targets1, num_classes=C1)
    assert jnp.allclose(loss1, ref1, rtol=2e-3, atol=2e-3), (loss1, ref1)

    # ---- 5) spatial size not a multiple of 128 (flat pixel-index masking path) ----
    B2, C2, H2, W2 = 2, 2, 10, 10
    logits2 = jax.random.normal(ks[8], (B2, C2, H2, W2), dtype=jnp.float32)
    targets2 = jax.random.randint(ks[9], (B2, H2, W2), 0, C2).astype(jnp.int32)
    fn2 = jax.jit(functools.partial(tversky_loss, num_classes=C2))
    loss2 = jax.block_until_ready(fn2(logits2, targets2))
    ref2 = _reference_loss(logits2, targets2, num_classes=C2)
    assert jnp.allclose(loss2, ref2, rtol=2e-3, atol=2e-3), (loss2, ref2)

    print("KERNEL_OK")
</pallas_src>

<mosaic_0001>
module attributes {stable_mosaic.version = 11 : i64} {
  func.func @_tversky_sums_kernel(%arg0: i32, %arg1: i32, %arg2: i32, %arg3: memref<1x4x2x128xf32, #tpu.memory_space<vmem>>, %arg4: memref<1x2x128xi32, #tpu.memory_space<vmem>>, %arg5: memref<1x1x4x128xf32, #tpu.memory_space<vmem>>, %arg6: memref<1x1x4x128xf32, #tpu.memory_space<vmem>>, %arg7: memref<1x1x4x128xf32, #tpu.memory_space<vmem>>) attributes {dimension_semantics = [#tpu.dimension_semantics<parallel>, #tpu.dimension_semantics<parallel>, #tpu.dimension_semantics<arbitrary>], iteration_bounds = array<i64: 2, 1, 1>, scalar_prefetch = 0 : i64, scratch_operands = 0 : i64, tpu.core_type = #tpu.core_type<tc>, window_params = [{transform_indices = @transform_0, window_bounds = array<i64: 1, 4, 2, 128>}, {transform_indices = @transform_1, window_bounds = array<i64: 1, 2, 128>}, {transform_indices = @transform_2, window_bounds = array<i64: 1, 1, 4, 128>}, {transform_indices = @transform_3, window_bounds = array<i64: 1, 1, 4, 128>}, {transform_indices = @transform_4, window_bounds = array<i64: 1, 1, 4, 128>}]} {
    %c0_i32 = arith.constant 0 : i32
    %0 = arith.cmpi eq, %arg2, %c0_i32 : i32
    %1 = arith.extui %0 : i1 to i32
    %c0_i32_0 = arith.constant 0 : i32
    %2 = arith.cmpi ne, %1, %c0_i32_0 : i32
    scf.if %2 {
      %cst_40 = arith.constant 0.000000e+00 : f32
      %63 = vector.broadcast %cst_40 : f32 to vector<1x1x4x128xf32>
      %c0_41 = arith.constant 0 : index
      %c0_42 = arith.constant 0 : index
      %c0_43 = arith.constant 0 : index
      %c0_44 = arith.constant 0 : index
      %64 = vector.load %arg5[%c0_41, %c0_42, %c0_43, %c0_44] : memref<1x1x4x128xf32, #tpu.memory_space<vmem>>, vector<1x1x4x128xf32>
      tpu.vector_store %arg5[%c0_41, %c0_42, %c0_43, %c0_44], %63 {strides = array<i32>} : memref<1x1x4x128xf32, #tpu.memory_space<vmem>>, vector<1x1x4x128xf32>,
      %cst_45 = arith.constant 0.000000e+00 : f32
      %65 = vector.broadcast %cst_45 : f32 to vector<1x1x4x128xf32>
      %c0_46 = arith.constant 0 : index
      %c0_47 = arith.constant 0 : index
      %c0_48 = arith.constant 0 : index
      %c0_49 = arith.constant 0 : index
      %66 = vector.load %arg6[%c0_46, %c0_47, %c0_48, %c0_49] : memref<1x1x4x128xf32, #tpu.memory_space<vmem>>, vector<1x1x4x128xf32>
      tpu.vector_store %arg6[%c0_46, %c0_47, %c0_48, %c0_49], %65 {strides = array<i32>} : memref<1x1x4x128xf32, #tpu.memory_space<vmem>>, vector<1x1x4x128xf32>,
      %cst_50 = arith.constant 0.000000e+00 : f32
      %67 = vector.broadcast %cst_50 : f32 to vector<1x1x4x128xf32>
      %c0_51 = arith.constant 0 : index
      %c0_52 = arith.constant 0 : index
      %c0_53 = arith.constant 0 : index
      %c0_54 = arith.constant 0 : index
      %68 = vector.load %arg7[%c0_51, %c0_52, %c0_53, %c0_54] : memref<1x1x4x128xf32, #tpu.memory_space<vmem>>, vector<1x1x4x128xf32>
      tpu.vector_store %arg7[%c0_51, %c0_52, %c0_53, %c0_54], %67 {strides = array<i32>} : memref<1x1x4x128xf32, #tpu.memory_space<vmem>>, vector<1x1x4x128xf32>,
    } else {
    }
    %c1_i32 = arith.constant 1 : i32
    %3 = arith.muli %arg1, %c1_i32 : i32
    %4 = arith.addi %3, %arg2 : i32
    %c2_i32 = arith.constant 2 : i32
    %5 = arith.muli %4, %c2_i32 : i32
    %6 = tpu.iota {dimensions = array<i32: 0>} : vector<2x128xi32>
    %7 = vector.broadcast %5 : i32 to vector<2x128xi32>
    %8 = arith.addi %7, %6 : vector<2x128xi32>
    %c2_i32_1 = arith.constant 2 : i32
    %9 = vector.broadcast %c2_i32_1 : i32 to vector<2x128xi32>
    %10 = arith.cmpi slt, %8, %9 : vector<2x128xi32>
    %c0 = arith.constant 0 : index
    %c0_2 = arith.constant 0 : index
    %c0_3 = arith.constant 0 : index
    %11 = vector.load %arg4[%c0, %c0_2, %c0_3] : memref<1x2x128xi32, #tpu.memory_space<vmem>>, vector<1x2x128xi32>
    %12 = vector.shape_cast %11 : vector<1x2x128xi32> to vector<2x128xi32>
    %c255_i32 = arith.constant 255 : i32
    %13 = vector.broadcast %c255_i32 : i32 to vector<2x128xi32>
    %14 = arith.cmpi ne, %12, %13 : vector<2x128xi32>
    %15 = arith.andi %10, %14 : vector<2x128xi1>
    %16 = arith.extui %15 : vector<2x128xi1> to vector<2x128xi32>
    %17 = arith.sitofp %16 : vector<2x128xi32> to vector<2x128xf32>
    %c-1_i32 = arith.constant -1 : i32
    %18 = vector.broadcast %c-1_i32 : i32 to vector<2x128xi32>
    %19 = arith.select %15, %12, %18 : vector<2x128xi1>, vector<2x128xi32>
    %c0_4 = arith.constant 0 : index
    %c0_5 = arith.constant 0 : index
    %c0_6 = arith.constant 0 : index
    %c0_7 = arith.constant 0 : index
    %20 = vector.load %arg3[%c0_4, %c0_5, %c0_6, %c0_7] : memref<1x4x2x128xf32, #tpu.memory_space<vmem>>, vector<1x4x2x128xf32>
    %21 = vector.shape_cast %20 : vector<1x4x2x128xf32> to vector<4x2x128xf32>
    %22 = vector.shape_cast %10 : vector<2x128xi1> to vector<1x2x128xi1>
    %cst = arith.constant 0.000000e+00 : f32
    %23 = vector.shape_cast %22 : vector<1x2x128xi1> to vector<1x2x128xi1>
    %24 = vector.broadcast %23 : vector<1x2x128xi1> to vector<4x2x128xi1>
    %25 = vector.broadcast %cst : f32 to vector<4x2x128xf32>
    %26 = arith.select %24, %21, %25 : vector<4x2x128xi1>, vector<4x2x128xf32>
    %cst_8 = arith.constant dense<0xFF800000> : vector<2x128xf32>
    %27 = vector.multi_reduction <maximumf>, %26, %cst_8 [0] : vector<4x2x128xf32> to vector<2x128xf32>
    %28 = vector.shape_cast %27 : vector<2x128xf32> to vector<1x2x128xf32>
    %29 = vector.broadcast %28 : vector<1x2x128xf32> to vector<4x2x128xf32>
    %30 = arith.subf %26, %29 : vector<4x2x128xf32>
    %31 = math.exp %30 : vector<4x2x128xf32>
    %cst_9 = arith.constant dense<0.000000e+00> : vector<2x128xf32>
    %32 = vector.multi_reduction <add>, %31, %cst_9 [0] : vector<4x2x128xf32> to vector<2x128xf32>
    %33 = tpu.reciprocal %32 : vector<2x128xf32> -> vector<2x128xf32>
    %34 = arith.mulf %17, %33 : vector<2x128xf32>
    %35 = vector.shape_cast %34 : vector<2x128xf32> to vector<1x2x128xf32>
    %36 = vector.broadcast %35 : vector<1x2x128xf32> to vector<4x2x128xf32>
    %37 = arith.mulf %31, %36 : vector<4x2x128xf32>
    %38 = tpu.iota {dimensions = array<i32: 0>} : vector<4x1x1xi32>
    %39 = vector.shape_cast %19 : vector<2x128xi32> to vector<1x2x128xi32>
    %40 = vector.broadcast %38 : vector<4x1x1xi32> to vector<4x2x128xi32>
    %41 = vector.broadcast %39 : vector<1x2x128xi32> to vector<4x2x128xi32>
    %42 = arith.cmpi eq, %40, %41 : vector<4x2x128xi32>
    %c0_10 = arith.constant 0 : index
    %c0_11 = arith.constant 0 : index
    %c0_12 = arith.constant 0 : index
    %c0_13 = arith.constant 0 : index
    %43 = vector.load %arg5[%c0_10, %c0_11, %c0_12, %c0_13] : memref<1x1x4x128xf32, #tpu.memory_space<vmem>>, vector<1x1x4x128xf32>
    %cst_14 = arith.constant dense<0.000000e+00> : vector<4x128xf32>
    %44 = vector.multi_reduction <add>, %37, %cst_14 [1] : vector<4x2x128xf32> to vector<4x128xf32>
    %45 = vector.shape_cast %44 : vector<4x128xf32> to vector<1x1x4x128xf32>
    %46 = arith.addf %43, %45 : vector<1x1x4x128xf32>
    %c0_15 = arith.constant 0 : index
    %c0_16 = arith.constant 0 : index
    %c0_17 = arith.constant 0 : index
    %c0_18 = arith.constant 0 : index
    %47 = vector.load %arg5[%c0_15, %c0_16, %c0_17, %c0_18] : memref<1x1x4x128xf32, #tpu.memory_space<vmem>>, vector<1x1x4x128xf32>
    tpu.vector_store %arg5[%c0_15, %c0_16, %c0_17, %c0_18], %46 {strides = array<i32>} : memref<1x1x4x128xf32, #tpu.memory_space<vmem>>, vector<1x1x4x128xf32>,
    %c0_19 = arith.constant 0 : index
    %c0_20 = arith.constant 0 : index
    %c0_21 = arith.constant 0 : index
    %c0_22 = arith.constant 0 : index
    %48 = vector.load %arg6[%c0_19, %c0_20, %c0_21, %c0_22] : memref<1x1x4x128xf32, #tpu.memory_space<vmem>>, vector<1x1x4x128xf32>
    %cst_23 = arith.constant 0.000000e+00 : f32
    %49 = vector.broadcast %cst_23 : f32 to vector<4x2x128xf32>
    %50 = arith.select %42, %37, %49 : vector<4x2x128xi1>, vector<4x2x128xf32>
    %cst_24 = arith.constant dense<0.000000e+00> : vector<4x128xf32>
    %51 = vector.multi_reduction <add>, %50, %cst_24 [1] : vector<4x2x128xf32> to vector<4x128xf32>
    %52 = vector.shape_cast %51 : vector<4x128xf32> to vector<1x1x4x128xf32>
    %53 = arith.addf %48, %52 : vector<1x1x4x128xf32>
    %c0_25 = arith.constant 0 : index
    %c0_26 = arith.constant 0 : index
    %c0_27 = arith.constant 0 : index
    %c0_28 = arith.constant 0 : index
    %54 = vector.load %arg6[%c0_25, %c0_26, %c0_27, %c0_28] : memref<1x1x4x128xf32, #tpu.memory_space<vmem>>, vector<1x1x4x128xf32>
    tpu.vector_store %arg6[%c0_25, %c0_26, %c0_27, %c0_28], %53 {strides = array<i32>} : memref<1x1x4x128xf32, #tpu.memory_space<vmem>>, vector<1x1x4x128xf32>,
    %c0_29 = arith.constant 0 : index
    %c0_30 = arith.constant 0 : index
    %c0_31 = arith.constant 0 : index
    %c0_32 = arith.constant 0 : index
    %55 = vector.load %arg7[%c0_29, %c0_30, %c0_31, %c0_32] : memref<1x1x4x128xf32, #tpu.memory_space<vmem>>, vector<1x1x4x128xf32>
    %cst_33 = arith.constant 1.000000e+00 : f32
    %cst_34 = arith.constant 0.000000e+00 : f32
    %56 = vector.broadcast %cst_33 : f32 to vector<4x2x128xf32>
    %57 = vector.broadcast %cst_34 : f32 to vector<4x2x128xf32>
    %58 = arith.select %42, %56, %57 : vector<4x2x128xi1>, vector<4x2x128xf32>
    %cst_35 = arith.constant dense<0.000000e+00> : vector<4x128xf32>
    %59 = vector.multi_reduction <add>, %58, %cst_35 [1] : vector<4x2x128xf32> to vector<4x128xf32>
    %60 = vector.shape_cast %59 : vector<4x128xf32> to vector<1x1x4x128xf32>
    %61 = arith.addf %55, %60 : vector<1x1x4x128xf32>
    %c0_36 = arith.constant 0 : index
    %c0_37 = arith.constant 0 : index
    %c0_38 = arith.constant 0 : index
    %c0_39 = arith.constant 0 : index
    %62 = vector.load %arg7[%c0_36, %c0_37, %c0_38, %c0_39] : memref<1x1x4x128xf32, #tpu.memory_space<vmem>>, vector<1x1x4x128xf32>
    tpu.vector_store %arg7[%c0_36, %c0_37, %c0_38, %c0_39], %61 {strides = array<i32>} : memref<1x1x4x128xf32, #tpu.memory_space<vmem>>, vector<1x1x4x128xf32>,
    return
  }
  func.func @transform_0(%arg0: i32, %arg1: i32, %arg2: i32) -> (i32, i32, i32, i32) {
    %c1_i32 = arith.constant 1 : i32
    %0 = arith.muli %arg1, %c1_i32 : i32
    %1 = arith.addi %0, %arg2 : i32
    %c0_i32 = arith.constant 0 : i32
    %2 = arith.minsi %1, %c0_i32 : i32
    %c0_i32_0 = arith.constant 0 : i32
    %c0_i32_1 = arith.constant 0 : i32
    %c0_i32_2 = arith.constant 0 : i32
    return %arg0, %c0_i32_0, %2, %c0_i32_1 : i32, i32, i32, i32
  }
  func.func @transform_1(%arg0: i32, %arg1: i32, %arg2: i32) -> (i32, i32, i32) {
    %c1_i32 = arith.constant 1 : i32
    %0 = arith.muli %arg1, %c1_i32 : i32
    %1 = arith.addi %0, %arg2 : i32
    %c0_i32 = arith.constant 0 : i32
    %2 = arith.minsi %1, %c0_i32 : i32
    %c0_i32_0 = arith.constant 0 : i32
    %c0_i32_1 = arith.constant 0 : i32
    return %arg0, %2, %c0_i32_0 : i32, i32, i32
  }
  func.func @transform_2(%arg0: i32, %arg1: i32, %arg2: i32) -> (i32, i32, i32, i32) {
    %c0_i32 = arith.constant 0 : i32
    %c0_i32_0 = arith.constant 0 : i32
    %c0_i32_1 = arith.constant 0 : i32
    return %arg0, %arg1, %c0_i32, %c0_i32_0 : i32, i32, i32, i32
  }
  func.func @transform_3(%arg0: i32, %arg1: i32, %arg2: i32) -> (i32, i32, i32, i32) {
    %c0_i32 = arith.constant 0 : i32
    %c0_i32_0 = arith.constant 0 : i32
    %c0_i32_1 = arith.constant 0 : i32
    return %arg0, %arg1, %c0_i32, %c0_i32_0 : i32, i32, i32, i32
  }
  func.func @transform_4(%arg0: i32, %arg1: i32, %arg2: i32) -> (i32, i32, i32, i32) {
    %c0_i32 = arith.constant 0 : i32
    %c0_i32_0 = arith.constant 0 : i32
    %c0_i32_1 = arith.constant 0 : i32
    return %arg0, %arg1, %c0_i32, %c0_i32_0 : i32, i32, i32, i32
  }
}

</mosaic_0001>

<bundles_post_ra>
// kernel: tversky_loss.1
= control target key start
LH: loop header
LB: loop body
LE: loop exit
PB: predicated region body
PF: predicated region fallthrough
CT: control target
= control target key end

     0   :  { %s813_s15 = smov 0   ;;  %s815_s16 = smov 0   ;;  %s942_s0 = inlined_call_operand.vmem [shape: f32[2,4,2,128], index: 0, kind: input, shape index: {}]   ;;  %s943_s1 = inlined_call_operand.vmem [shape: s32[2,2,128], index: 1, kind: input, shape index: {}]   ;;  %s944_s2 = inlined_call_operand.vmem [shape: f32[2,1,4,128], index: 2, kind: output, shape index: {0}]   ;;  %s945_s3 = inlined_call_operand.vmem [shape: f32[2,1,4,128], index: 3, kind: output, shape index: {1}]   ;;  %s946_s4 = inlined_call_operand.vmem [shape: f32[2,1,4,128], index: 4, kind: output, shape index: {2}]  }
   0x1   :  { %s817_s17 = smov 0  }
   0x2 LB: > { %s34_s18 = sadd.s32 1, %s781_s16  ;;  %p717_p0 = scmp.ge.s32.totalorder %s785_s17, 1  ;;  %s785_s17 = sphi %s817_s17, %s15_s17   ;;  %s781_s16 = sphi %s815_s16, %s950_s16   ;;  %s777_s15 = sphi %s813_s15, %s949_s15  }
   0x3   : > { %p36_p1 = scmp.ge.s32.totalorder %s34_s18, 2  ;;  %p235_p2 = scmp.lt.s32.totalorder %s785_s17, 3 }
   0x5   : > { %s952_s18 = smov (%p36_p1, %s34_s18), 0  ;;  %p236_p3 = pnand %p717_p0, %p235_p2 }
   0x6   : > { %p296_p4 = scmp.lt.s32.totalorder (!%p236_p3), %s777_s15, 1  ;;  %v350_v0 = vlaneseq (!%p236_p3)  ;;  %vm371_vm1 = vcmask (!%p236_p3), 1041408   ;;  %v787_v7 = vmov (!%p236_p3), 0.0   ;;  %vm441_vm8 = vcmask (!%p236_p3), 1041409  }
   0x7   : > { %239 = sbr.rel (%p236_p3) target bundleno = 88 (0x58), region = 28  ;;  %vm443_vm9 = vcmask (!%p236_p3), 1042434   ;;  %vm445_vm10 = vcmask (!%p236_p3), 1043459  }
   0x8   : > { %v351_v1 = vshrl.u32 (!%p236_p3), %v350_v0, 7 }
   0xa   : > { %vm354_vm0 = vcmp.lt.s32.totalorder (!%p236_p3), %v351_v1, 2 }
   0xe   : > { %s954_s15 = smov (!%p296_p4, %s777_s15), 1 }
   0xf   : > { %s727_s19 = sshll.u32 %s954_s15, 3  ;;  %s720_s20 = sshll.u32 %s954_s15, 1 }
  0x10   : > { %s303_s23 = scalar_lea.vmem %s942_s0, %s727_s19  ;;  %s316_s26 = scalar_lea.vmem %s943_s1, %s720_s20 }
  0x11   : > { %s721_s27 = sshll.u32 %s954_s15, 2  ;;  %v355_v2 = vld [vmem:[%s316_s26] sm:$0x3]  ;;  %v362_v4 = vld [vmem:[%s303_s23 + $0x2] sm:$0x3] }
  0x12   : > { %v361_v3 = vld [vmem:[%s303_s23] sm:$0x3]  ;;  %s840_s30 = scalar_lea.vmem %s944_s2, %s721_s27  ;;  %vm356_vm2 = vcmp.ne.s32.totalorder %v355_v2, 255  ;;  %v363_v5 = vld [vmem:[%s303_s23 + $0x4] sm:$0x3]  ;;  %s846_s7 = scalar_lea.vmem %s945_s3, %s721_s27  ;;  %v368_v10 = vsel %vm354_vm0, %v362_v4, 0.0 }
  0x13   : > { %v367_v6 = vsel %vm354_vm0, %v361_v3, 0.0  ;;  %345 = vst [vmem:[%s840_s30] sm:$0xf] %v787_v7  ;;  %vm851_vm3 = vmand %vm354_vm0, %vm356_vm2  ;;  %v364_v9 = vld [vmem:[%s303_s23 + $0x6] sm:$0x3]  ;;  %v369_v11 = vsel %vm354_vm0, %v363_v5, 0.0  ;;  %s863_s10 = scalar_lea.vmem %s946_s4, %s721_s27  ;;  %v373_v15 = vsel %vm371_vm1, %v368_v10, -inf }
  0x14   : > { %v372_v12 = vsel %vm371_vm1, %v367_v6, -inf  ;;  %346 = vst [vmem:[%s846_s7] sm:$0xf] %v787_v7  ;;  %v867_v13 = vsel %vm851_vm3, %v355_v2, 4294967295  ;;  %v370_v14 = vsel %vm354_vm0, %v364_v9, 0.0  ;;  %347 = vst [vmem:[%s863_s10] sm:$0xf] %v787_v7  ;;  %v374_v16 = vsel %vm371_vm1, %v369_v11, -inf }
  0x15   : > { %v375_v17 = vsel %vm371_vm1, %v370_v14, -inf  ;;  %v376_v18 = vmax.f32 %v372_v12, %v373_v15  ;;  %vm404_vm4 = vcmp.eq.s32.totalorder %v867_v13, 0  ;;  %vm405_vm5 = vcmp.eq.s32.totalorder %v867_v13, 1 }
  0x16   : > { %v377_v19 = vmax.f32 %v374_v16, %v375_v17  ;;  %vm406_vm6 = vcmp.eq.s32.totalorder %v867_v13, 2  ;;  %v494_v20 = vsel %vm404_vm4, 1.0, %v787_v7  ;;  %v495_v21 = vsel %vm405_vm5, 1.0, %v787_v7 }
  0x17   : > { %vm407_vm7 = vcmp.eq.s32.totalorder %v867_v13, 3  ;;  %v496_v22 = vsel %vm406_vm6, 1.0, %v787_v7  ;;  %v498_v23 = vsel %vm371_vm1, %v494_v20, 0.0  ;;  %v505_v27 = vsel %vm371_vm1, %v495_v21, 0.0 }
  0x18   : > { %v378_v24 = vmax.f32 %v376_v18, %v377_v19  ;;  %v497_v25 = vsel %vm407_vm7, 1.0, %v787_v7  ;;  %v499_v26 = vrot.slane %v498_v23, 4  ;;  %v506_v28 = vrot.slane %v505_v27, 4 }
  0x19   : > { %v512_v29 = vsel %vm371_vm1, %v496_v22, 0.0  ;;  %v519_v30 = vsel %vm371_vm1, %v497_v25, 0.0  ;;  %v724_v16 = vsel %vm851_vm3, 1.0, %v787_v7 }
  0x1a   : > { %v379_v31 = vsub.f32 %v367_v6, %v378_v24  ;;  %v380_v32 = vsub.f32 %v368_v10, %v378_v24  ;;  %v381_v33 = vsub.f32 %v369_v11, %v378_v24  ;;  %v382_v34 = vsub.f32 %v370_v14, %v378_v24 }
  0x1b   : > { %v500_v35 = vadd.f32 %v499_v26, %v498_v23  ;;  %v507_v36 = vadd.f32 %v506_v28, %v505_v27  ;;  %v513_v37 = vrot.slane %v512_v29, 4  ;;  %v520_v38 = vrot.slane %v519_v30, 4  ;;  %v493_v61 = vld [vmem:[%s863_s10] sm:$0xf] }
  0x1c   : > { %v383_v39 = vmul.f32 1.442695, %v379_v31  ;;  %v385_v40 = vmul.f32 1.442695, %v380_v32  ;;  %v387_v41 = vmul.f32 1.442695, %v381_v33 }
  0x1d   : > { %v389_v42 = vmul.f32 1.442695, %v382_v34  ;;  %v501_v43 = vrot.slane %v500_v35, 2  ;;  %v508_v44 = vrot.slane %v507_v36, 2  ;;  %v514_v45 = vadd.f32 %v513_v37, %v512_v29 }
  0x1e   : > { %753 = vpow2.f32 %v383_v39  ;;  %v521_v46 = vadd.f32 %v520_v38, %v519_v30 }
  0x1f   : > { %755 = vpow2.f32 %v385_v40  ;;  %v502_v47 = vadd.f32 %v501_v43, %v500_v35  ;;  %v509_v48 = vadd.f32 %v508_v44, %v507_v36  ;;  %v515_v49 = vrot.slane %v514_v45, 2 }
  0x20   : > { %757 = vpow2.f32 %v387_v41  ;;  %v522_v50 = vrot.slane %v521_v46, 2 }
  0x21   : > { %759 = vpow2.f32 %v389_v42  ;;  %v503_v51 = vrot.slane %v502_v47, 1  ;;  %v510_v52 = vrot.slane %v509_v48, 1  ;;  %v516_v53 = vadd.f32 %v515_v49, %v514_v45 }
  0x22   : > { %v523_v54 = vadd.f32 %v522_v50, %v521_v46 }
  0x23   : > { %v504_v55 = vadd.f32 %v503_v51, %v502_v47  ;;  %v511_v56 = vadd.f32 %v510_v52, %v509_v48  ;;  %v517_v57 = vrot.slane %v516_v53, 1 }
  0x24   : > { %v524_v58 = vrot.slane %v523_v54, 1 }
  0x25   : > { %v518_v59 = vadd.f32 %v517_v57, %v516_v53  ;;  %v530_v60 = vsel %vm441_vm8, %v511_v56, %v504_v55 }
  0x26   : > { %v525_v62 = vadd.f32 %v524_v58, %v523_v54 }
  0x27   : > { %v531_v63 = vsel %vm443_vm9, %v518_v59, %v530_v60 }
  0x28   : > { %v754_v0 = vpop.eup %753  ;;  %v532_v1 = vsel %vm445_vm10, %v525_v62, %v531_v63 }
  0x29   : > { %v756_v2 = vpop.eup %755  ;;  %v391_v3 = vsel %vm371_vm1, %v754_v0, 0.0  ;;  %v534_v4 = vadd.f32 %v532_v1, %v493_v61 }
  0x2a   : > { %v758_v5 = vpop.eup %757  ;;  %v392_v6 = vsel %vm371_vm1, %v756_v2, 0.0 }
  0x2b   : > { %v760_v9 = vpop.eup %759  ;;  %v393_v10 = vadd.f32 %v392_v6, %v391_v3  ;;  %v394_v11 = vsel %vm371_vm1, %v758_v5, 0.0  ;;  %535 = vst [vmem:[%s863_s10] sm:$0xf] %v534_v4 }
  0x2c   : > { %v396_v12 = vsel %vm371_vm1, %v760_v9, 0.0 }
  0x2d   : > { %v395_v14 = vadd.f32 %v394_v11, %v393_v10  ;;  %v408_v10 = vld [vmem:[%s840_s30] sm:$0xf] }
  0x2f   : > { %v397_v15 = vadd.f32 %v396_v12, %v395_v14 }
  0x31   : > { %761 = vrcp.f32 %v397_v15 }
  0x3b   : > { %v762_v17 = vpop.eup %761 }
  0x3c   : > { %v399_v18 = vmul.f32 %v762_v17, %v724_v16 }
  0x3e   : > { %v400_v19 = vmul.f32 %v754_v0, %v399_v18  ;;  %v401_v20 = vmul.f32 %v756_v2, %v399_v18  ;;  %v402_v21 = vmul.f32 %v758_v5, %v399_v18  ;;  %v403_v22 = vmul.f32 %v760_v9, %v399_v18 }
  0x40   : > { %v451_v23 = vsel %vm404_vm4, %v400_v19, 0.0  ;;  %v452_v24 = vsel %vm405_vm5, %v401_v20, 0.0  ;;  %v409_v25 = vsel %vm371_vm1, %v400_v19, 0.0  ;;  %v416_v26 = vsel %vm371_vm1, %v401_v20, 0.0 }
  0x41   : > { %v410_v27 = vrot.slane %v409_v25, 4  ;;  %v417_v28 = vrot.slane %v416_v26, 4  ;;  %v423_v7 = vsel %vm371_vm1, %v402_v21, 0.0  ;;  %v430_v8 = vsel %vm371_vm1, %v403_v22, 0.0 }
  0x42   : > { %v424_v29 = vrot.slane %v423_v7, 4  ;;  %v431_v30 = vrot.slane %v430_v8, 4  ;;  %v453_v31 = vsel %vm406_vm6, %v402_v21, 0.0  ;;  %v454_v32 = vsel %vm407_vm7, %v403_v22, 0.0 }
  0x43   : > { %v411_v33 = vadd.f32 %v410_v27, %v409_v25  ;;  %v418_v34 = vadd.f32 %v417_v28, %v416_v26  ;;  %v455_v35 = vsel %vm371_vm1, %v451_v23, 0.0  ;;  %v462_v36 = vsel %vm371_vm1, %v452_v24, 0.0  ;;  %v450_v25 = vld [vmem:[%s846_s7] sm:$0xf] }
  0x44   : > { %v425_v37 = vadd.f32 %v424_v29, %v423_v7  ;;  %v432_v38 = vadd.f32 %v431_v30, %v430_v8  ;;  %v456_v39 = vrot.slane %v455_v35, 4  ;;  %v463_v40 = vrot.slane %v462_v36, 4 }
  0x45   : > { %v412_v41 = vrot.slane %v411_v33, 2  ;;  %v419_v42 = vrot.slane %v418_v34, 2  ;;  %v469_v43 = vsel %vm371_vm1, %v453_v31, 0.0  ;;  %v476_v44 = vsel %vm371_vm1, %v454_v32, 0.0 }
  0x46   : > { %v426_v45 = vrot.slane %v425_v37, 2  ;;  %v433_v46 = vrot.slane %v432_v38, 2  ;;  %v457_v13 = vadd.f32 %v456_v39, %v455_v35  ;;  %v464_v47 = vadd.f32 %v463_v40, %v462_v36 }
  0x47   : > { %v413_v48 = vadd.f32 %v412_v41, %v411_v33  ;;  %v420_v49 = vadd.f32 %v419_v42, %v418_v34  ;;  %v470_v50 = vrot.slane %v469_v43, 4  ;;  %v477_v51 = vrot.slane %v476_v44, 4 }
  0x48   : > { %v427_v52 = vadd.f32 %v426_v45, %v425_v37  ;;  %v434_v53 = vadd.f32 %v433_v46, %v432_v38  ;;  %v458_v54 = vrot.slane %v457_v13, 2  ;;  %v465_v55 = vrot.slane %v464_v47, 2 }
  0x49   : > { %v414_v56 = vrot.slane %v413_v48, 1  ;;  %v421_v57 = vrot.slane %v420_v49, 1  ;;  %v471_v58 = vadd.f32 %v470_v50, %v469_v43  ;;  %v478_v59 = vadd.f32 %v477_v51, %v476_v44 }
  0x4a   : > { %v428_v60 = vrot.slane %v427_v52, 1  ;;  %v435_v61 = vrot.slane %v434_v53, 1  ;;  %v459_v62 = vadd.f32 %v458_v54, %v457_v13  ;;  %v466_v63 = vadd.f32 %v465_v55, %v464_v47 }
  0x4b   : > { %v415_v0 = vadd.f32 %v414_v56, %v413_v48  ;;  %v422_v1 = vadd.f32 %v421_v57, %v420_v49  ;;  %v472_v2 = vrot.slane %v471_v58, 2  ;;  %v479_v3 = vrot.slane %v478_v59, 2 }
  0x4c   : > { %v429_v4 = vadd.f32 %v428_v60, %v427_v52  ;;  %v436_v5 = vadd.f32 %v435_v61, %v434_v53  ;;  %v460_v6 = vrot.slane %v459_v62, 1  ;;  %v467_v9 = vrot.slane %v466_v63, 1 }
  0x4d   : > { %v442_v11 = vsel %vm441_vm8, %v422_v1, %v415_v0  ;;  %v473_v12 = vadd.f32 %v472_v2, %v471_v58  ;;  %v480_v14 = vadd.f32 %v479_v3, %v478_v59 }
  0x4e   : > { %v444_v15 = vsel %vm443_vm9, %v429_v4, %v442_v11  ;;  %v461_v16 = vadd.f32 %v460_v6, %v459_v62  ;;  %v468_v17 = vadd.f32 %v467_v9, %v466_v63 }
  0x4f   : > { %v446_v18 = vsel %vm445_vm10, %v436_v5, %v444_v15  ;;  %v474_v19 = vrot.slane %v473_v12, 1  ;;  %v481_v20 = vrot.slane %v480_v14, 1 }
  0x50   : > { %v448_v21 = vadd.f32 %v446_v18, %v408_v10  ;;  %v487_v22 = vsel %vm441_vm8, %v468_v17, %v461_v16 }
  0x51   : > { %v475_v23 = vadd.f32 %v474_v19, %v473_v12  ;;  %v482_v24 = vadd.f32 %v481_v20, %v480_v14 }
  0x52   : > { %449 = vst [vmem:[%s840_s30] sm:$0xf] %v448_v21 }
  0x53   : > { %v488_v26 = vsel %vm443_vm9, %v475_v23, %v487_v22 }
  0x54   : > { %v489_v27 = vsel %vm445_vm10, %v482_v24, %v488_v26 }
  0x55   : > { %v491_v28 = vadd.f32 %v489_v27, %v450_v25 }
  0x57   : > { %492 = vst [vmem:[%s846_s7] sm:$0xf] %v491_v28 }
  0x58 PF: > { %s15_s17 = sadd.s32 1, %s785_s17   ;;  %s949_s15 = smov %s781_s16 }
  0x59   : > { %p12_p5 = scmp.ge.s32.totalorder %s15_s17, 4   ;;  %s950_s16 = smov %s952_s18 }
  0x5b   :  { %14 = sbr.rel (!%p12_p5) target bundleno = 2 (0x2), region = 89 }

</bundles_post_ra>
